<compile_context>
chip_gen: v6e
topology: v6e:2x2x1
jax: 0.10.0
libtpu: 0.0.40
codegen_flags: <defaults>
</compile_context>

<pallas_src>
import jax
import jax.numpy as jnp
from jax.experimental import pallas as pl
from jax.experimental.pallas import tpu as pltpu


def generator_kernel(x_ref, w1_ref, b1_ref, w2_ref, b2_ref, o_ref):
    # x_ref : (d_in, bb)   noise tile, batch on lanes (lane-dense)
    # w1_ref: (H, d_in)    first Linear weight, PyTorch (out, in) layout
    # b1_ref: (H, 1)
    # w2_ref: (d_out, H)
    # b2_ref: (d_out, 1)
    # o_ref : (d_out, bb)
    x = x_ref[...]
    w1 = w1_ref[...]

    # First layer: K = d_in is tiny (2); the MXU would be pure push/pop
    # latency here, so use d_in broadcast FMAs on the VPU: (H,1)*(1,bb).
    h = b1_ref[...] + w1[:, 0:1] * x[0:1, :]
    for d in range(1, x.shape[0]):          # static unroll over d_in
        h = h + w1[:, d:d + 1] * x[d:d + 1, :]
    h = jnp.maximum(h, 0.0)                 # ReLU on the VPU

    # Second layer: K = 16, lane-dense N = bb -> keep it on the MXU.
    y = jnp.dot(w2_ref[...], h, preferred_element_type=jnp.float32)
    y = y + b2_ref[...]
    o_ref[...] = y.astype(o_ref.dtype)


def generator_forward(x, w1, b1, w2, b2, *, block_b=512, out_dtype=jnp.float32):
    """x: (B, d_in); w1: (H, d_in); b1: (H,); w2: (d_out, H); b2: (d_out,).

    Returns (B, d_out) == relu(x @ w1.T + b1) @ w2.T + b2 (PyTorch semantics).
    """
    B, d_in = x.shape
    H = w1.shape[0]
    d_out = w2.shape[0]

    # Transposed (lane-dense) layout: batch maps to the lane axis.
    x_t = x.T.astype(jnp.float32)                   # (d_in, B)
    b1c = b1.reshape(H, 1).astype(jnp.float32)
    b2c = b2.reshape(d_out, 1).astype(jnp.float32)

    # Batch tile: a multiple of 128 lanes when tiled, else the full small batch
    # (full-array block dims always satisfy the (8, 128) tiling rule).
    if B > block_b:
        bb = block_b                                # 512: multiple of 128
        b_pad = pl.cdiv(B, bb) * bb
    else:
        bb = B
        b_pad = B
    if b_pad != B:
        x_t = jnp.pad(x_t, ((0, 0), (0, b_pad - B)))

    grid = (b_pad // bb,)
    flops = 2 * b_pad * (d_in * H + H * d_out) + b_pad * (2 * H + d_out)
    bytes_accessed = 4 * (x_t.size + b_pad * d_out + w1.size + w2.size + H + d_out)

    out_t = pl.pallas_call(
        generator_kernel,
        out_shape=jax.ShapeDtypeStruct((d_out, b_pad), out_dtype),
        grid_spec=pltpu.PrefetchScalarGridSpec(
            num_scalar_prefetch=0,
            grid=grid,
            in_specs=[
                pl.BlockSpec((d_in, bb), lambda i: (0, i)),   # x: pipelined over batch
                pl.BlockSpec((H, d_in), lambda i: (0, 0)),    # weights/biases pinned
                pl.BlockSpec((H, 1), lambda i: (0, 0)),
                pl.BlockSpec((d_out, H), lambda i: (0, 0)),
                pl.BlockSpec((d_out, 1), lambda i: (0, 0)),
            ],
            out_specs=pl.BlockSpec((d_out, bb), lambda i: (0, i)),
        ),
        compiler_params=pltpu.CompilerParams(
            # Batch tiles are independent -> shard across v7x's 2 TensorCores.
            dimension_semantics=("parallel",),
            # Tiny per-tile footprint; 32 MiB is safe on v5e/v6e (128 MiB) and
            # v7x (64 MiB/TC physical).
            vmem_limit_bytes=32 * 1024 * 1024,
        ),
        cost_estimate=pl.CostEstimate(
            flops=flops, transcendentals=0, bytes_accessed=bytes_accessed),
    )(x_t, w1.astype(jnp.float32), b1c, w2.astype(jnp.float32), b2c)

    # Back to the PyTorch (B, d_out) convention; drop batch padding.
    return out_t[:, :B].T


def init_params(key, input_dim, hidden_dim, output_dim):
    # PyTorch nn.Linear default init: U(-1/sqrt(fan_in), 1/sqrt(fan_in)),
    # weights stored as (out_features, in_features).
    k1, k2, k3, k4 = jax.random.split(key, 4)
    bound1 = 1.0 / jnp.sqrt(input_dim)
    bound2 = 1.0 / jnp.sqrt(hidden_dim)
    w1 = jax.random.uniform(k1, (hidden_dim, input_dim), jnp.float32, -bound1, bound1)
    b1 = jax.random.uniform(k2, (hidden_dim,), jnp.float32, -bound1, bound1)
    w2 = jax.random.uniform(k3, (output_dim, hidden_dim), jnp.float32, -bound2, bound2)
    b2 = jax.random.uniform(k4, (output_dim,), jnp.float32, -bound2, bound2)
    return w1, b1, w2, b2


if __name__ == "__main__":
    # Generator for a 2D Gaussian: input_dim=2 (noise), hidden=16, output_dim=2.
    input_dim, hidden_dim, output_dim = 2, 16, 2

    key = jax.random.PRNGKey(0)
    kx, kx2, kp = jax.random.split(key, 3)
    w1, b1, w2, b2 = init_params(kp, input_dim, hidden_dim, output_dim)

    def ref_forward(x):
        return jnp.maximum(x @ w1.T + b1, 0.0) @ w2.T + b2

    # Small batch: single grid step, full-array blocks.
    x_small = jax.random.normal(kx, (8, input_dim), jnp.float32)
    out_small = jax.block_until_ready(generator_forward(x_small, w1, b1, w2, b2))
    assert out_small.shape == (8, output_dim)
    assert jnp.allclose(out_small, ref_forward(x_small), atol=1e-5, rtol=1e-5)

    # Larger, non-multiple batch: exercises the padded, tiled, parallel grid path.
    x_big = jax.random.normal(kx2, (1000, input_dim), jnp.float32)
    out_big = jax.block_until_ready(generator_forward(x_big, w1, b1, w2, b2))
    assert out_big.shape == (1000, output_dim)
    assert jnp.allclose(out_big, ref_forward(x_big), atol=1e-5, rtol=1e-5)

    print("KERNEL_OK")
</pallas_src>

<mosaic_0001>
module attributes {stable_mosaic.version = 11 : i64} {
  func.func @generator_kernel(%arg0: i32, %arg1: memref<2x8xf32, #tpu.memory_space<vmem>>, %arg2: memref<16x2xf32, #tpu.memory_space<vmem>>, %arg3: memref<16x1xf32, #tpu.memory_space<vmem>>, %arg4: memref<2x16xf32, #tpu.memory_space<vmem>>, %arg5: memref<2x1xf32, #tpu.memory_space<vmem>>, %arg6: memref<2x8xf32, #tpu.memory_space<vmem>>) attributes {dimension_semantics = [#tpu.dimension_semantics<parallel>], iteration_bounds = array<i64: 1>, scalar_prefetch = 0 : i64, scratch_operands = 0 : i64, tpu.core_type = #tpu.core_type<tc>, window_params = [{transform_indices = @transform_0, window_bounds = array<i64: 2, 8>}, {pipeline_mode = #tpu.pipeline_mode<synchronous>, transform_indices = @transform_1, window_bounds = array<i64: 16, 2>}, {pipeline_mode = #tpu.pipeline_mode<synchronous>, transform_indices = @transform_2, window_bounds = array<i64: 16, 1>}, {pipeline_mode = #tpu.pipeline_mode<synchronous>, transform_indices = @transform_3, window_bounds = array<i64: 2, 16>}, {pipeline_mode = #tpu.pipeline_mode<synchronous>, transform_indices = @transform_4, window_bounds = array<i64: 2, 1>}, {transform_indices = @transform_5, window_bounds = array<i64: 2, 8>}]} {
    %c0 = arith.constant 0 : index
    %c0_0 = arith.constant 0 : index
    %0 = vector.load %arg1[%c0, %c0_0] : memref<2x8xf32, #tpu.memory_space<vmem>>, vector<2x8xf32>
    %c0_1 = arith.constant 0 : index
    %c0_2 = arith.constant 0 : index
    %1 = vector.load %arg2[%c0_1, %c0_2] : memref<16x2xf32, #tpu.memory_space<vmem>>, vector<16x2xf32>
    %c0_3 = arith.constant 0 : index
    %c0_4 = arith.constant 0 : index
    %2 = vector.load %arg3[%c0_3, %c0_4] : memref<16x1xf32, #tpu.memory_space<vmem>>, vector<16x1xf32>
    %3 = vector.extract_strided_slice %1 {offsets = [0, 0], sizes = [16, 1], strides = [1, 1]} : vector<16x2xf32> to vector<16x1xf32>
    %4 = vector.extract_strided_slice %0 {offsets = [0, 0], sizes = [1, 8], strides = [1, 1]} : vector<2x8xf32> to vector<1x8xf32>
    %5 = vector.broadcast %3 : vector<16x1xf32> to vector<16x8xf32>
    %6 = vector.broadcast %4 : vector<1x8xf32> to vector<16x8xf32>
    %7 = arith.mulf %5, %6 : vector<16x8xf32>
    %8 = vector.broadcast %2 : vector<16x1xf32> to vector<16x8xf32>
    %9 = arith.addf %8, %7 : vector<16x8xf32>
    %10 = vector.extract_strided_slice %1 {offsets = [0, 1], sizes = [16, 1], strides = [1, 1]} : vector<16x2xf32> to vector<16x1xf32>
    %11 = vector.extract_strided_slice %0 {offsets = [1, 0], sizes = [1, 8], strides = [1, 1]} : vector<2x8xf32> to vector<1x8xf32>
    %12 = vector.broadcast %10 : vector<16x1xf32> to vector<16x8xf32>
    %13 = vector.broadcast %11 : vector<1x8xf32> to vector<16x8xf32>
    %14 = arith.mulf %12, %13 : vector<16x8xf32>
    %15 = arith.addf %9, %14 : vector<16x8xf32>
    %cst = arith.constant 0.000000e+00 : f32
    %16 = vector.broadcast %cst : f32 to vector<16x8xf32>
    %17 = arith.maximumf %15, %16 : vector<16x8xf32>
    %c0_5 = arith.constant 0 : index
    %c0_6 = arith.constant 0 : index
    %18 = vector.load %arg4[%c0_5, %c0_6] : memref<2x16xf32, #tpu.memory_space<vmem>>, vector<2x16xf32>
    %cst_7 = arith.constant dense<0.000000e+00> : vector<2x8xf32>
    %19 = tpu.matmul %18, %17, %cst_7 {dimension_numbers = #tpu.dot_dimension_numbers<[1], [0], [0], [1], [0, 0, 1, 1], [], []>} : vector<2x16xf32>, vector<16x8xf32>, vector<2x8xf32> -> vector<2x8xf32>
    %c0_8 = arith.constant 0 : index
    %c0_9 = arith.constant 0 : index
    %20 = vector.load %arg5[%c0_8, %c0_9] : memref<2x1xf32, #tpu.memory_space<vmem>>, vector<2x1xf32>
    %21 = vector.broadcast %20 : vector<2x1xf32> to vector<2x8xf32>
    %22 = arith.addf %19, %21 : vector<2x8xf32>
    %c0_10 = arith.constant 0 : index
    %c0_11 = arith.constant 0 : index
    %23 = vector.load %arg6[%c0_10, %c0_11] : memref<2x8xf32, #tpu.memory_space<vmem>>, vector<2x8xf32>
    tpu.vector_store %arg6[%c0_10, %c0_11], %22 {strides = array<i32>} : memref<2x8xf32, #tpu.memory_space<vmem>>, vector<2x8xf32>,
    return
  }
  func.func @transform_0(%arg0: i32) -> (i32, i32) {
    %c0_i32 = arith.constant 0 : i32
    %c0_i32_0 = arith.constant 0 : i32
    return %c0_i32, %arg0 : i32, i32
  }
  func.func @transform_1(%arg0: i32) -> (i32, i32) {
    %c0_i32 = arith.constant 0 : i32
    %c0_i32_0 = arith.constant 0 : i32
    %c0_i32_1 = arith.constant 0 : i32
    return %c0_i32, %c0_i32_0 : i32, i32
  }
  func.func @transform_2(%arg0: i32) -> (i32, i32) {
    %c0_i32 = arith.constant 0 : i32
    %c0_i32_0 = arith.constant 0 : i32
    %c0_i32_1 = arith.constant 0 : i32
    return %c0_i32, %c0_i32_0 : i32, i32
  }
  func.func @transform_3(%arg0: i32) -> (i32, i32) {
    %c0_i32 = arith.constant 0 : i32
    %c0_i32_0 = arith.constant 0 : i32
    %c0_i32_1 = arith.constant 0 : i32
    return %c0_i32, %c0_i32_0 : i32, i32
  }
  func.func @transform_4(%arg0: i32) -> (i32, i32) {
    %c0_i32 = arith.constant 0 : i32
    %c0_i32_0 = arith.constant 0 : i32
    %c0_i32_1 = arith.constant 0 : i32
    return %c0_i32, %c0_i32_0 : i32, i32
  }
  func.func @transform_5(%arg0: i32) -> (i32, i32) {
    %c0_i32 = arith.constant 0 : i32
    %c0_i32_0 = arith.constant 0 : i32
    return %c0_i32, %arg0 : i32, i32
  }
}

</mosaic_0001>

<bundles_post_ra>
// kernel: tpu_custom_call.1
= control target key start
LH: loop header
LB: loop body
LE: loop exit
PB: predicated region body
PF: predicated region fallthrough
CT: control target
= control target key end

     0   :  { %v210_v2 = vmov 0   ;;  %s269_s0 = inlined_call_operand.vmem [shape: f32[2,8], index: 0, kind: input, shape index: {}]   ;;  %s270_s1 = inlined_call_operand.vmem [shape: f32[16,2], index: 1, kind: input, shape index: {}]   ;;  %s271_s2 = inlined_call_operand.vmem [shape: f32[16,1], index: 2, kind: input, shape index: {}]   ;;  %s272_s3 = inlined_call_operand.vmem [shape: f32[2,16], index: 3, kind: input, shape index: {}]   ;;  %s273_s4 = inlined_call_operand.vmem [shape: f32[2,1], index: 4, kind: input, shape index: {}]   ;;  %s274_s5 = inlined_call_operand.hbm [shape: f32[2,8], index: 5, kind: output, shape index: {}]  }
   0x1   :  { %v25_v0 = vld [vmem:[%s271_s2 + $0x8] sm:$0xff]  ;;  %186 = vset.pattern.permute.xlu1 %v210_v2  ;;  %185 = vset.pattern.permute.xlu0 %v210_v2 }
   0x2   :  { %v23_v1 = vld [vmem:[%s270_s1 + $0x8] sm:$0xff]  ;;  %49 = vperm.xlu1 %186, %v25_v0  }
   0x3   :  { %33 = vperm.xlu0 %185, %v23_v1  }
   0x4   :  { %10 = vsyncpa [#allocation3], 0  ;;  %v22_v3 = vld [vmem:[%s270_s1] sm:$0xff]  ;;  %v211_v4 = vmov 1   ;;  %v212_v6 = vmov 0.0   ;;  %vm213_vm0 = vmmov 0   ;;  %v36_v8 = vlaneseq }
   0x5   :  { %v24_v5 = vld [vmem:[%s271_s2] sm:$0xff]  ;;  %173 = vmatprep.subr.mxu0 %v212_v6  ;;  %177 = vmatprep.mubr.msk.f32.mxu0 %vm213_vm0, %v212_v6  ;;  %vm79_vm1 = vcmask 130048   ;;  %vm153_vm2 = vcmask 58368  }
   0x6   :  { %187 = vset.pattern.permute.xlu1 %v211_v4  ;;  %v73_v7 = vld [vmem:[%s273_s4] sm:$0x3]  ;;  %v37_v9 = vshrl.u32 %v36_v8, 7  ;;  %s214_s4 = smov [#allocation2]  }
   0x7   :  { %28 = vperm.xlu0 %185, %v22_v3   ;;  %59 = vperm.xlu1 %187, %v23_v1   ;;  %v21_v11 = vld [vmem:[%s269_s0] sm:$0x3]  ;;  %s161_s29 = sshll.u32 %s214_s4, 4  ;;  %s162_s29 = int_to_ptr.vmem [resolvable:$true] %s161_s29 }
   0x8   :  { %v38_v10 = vsub.s32 0, %v37_v9  ;;  %v64_v13 = vsub.s32 1, %v37_v9  ;;  %v72_v31 = vld [vmem:[%s272_s3] sm:$0x3]  ;;  %s188_s30 = scalar_lea.vmem %s162_s29, 32  ;;  %p193_p1 = scmp.lt.s32.totalorder %s162_s29, %s162_s29 }
   0x9   :  { %p189_p0 = scmp.ne.s32.totalorder %s162_s29, %s188_s30  ;;  %p194_p2 = scmp.lt.s32.totalorder %s188_s30, %s188_s30 }
   0xa   :  { %v39_v12 = vrot.slane %v21_v11, %v38_v10  ;;  %v65_v17 = vrot.slane %v21_v11, %v64_v13 }
   0xb   :  { %44 = vperm.xlu0 %185, %v24_v5   ;;  %55 = vperm.xlu1 %187, %v22_v3   ;;  %p195_p3 = por %p194_p2, %p193_p1 }
   0xd   :  { %p196_p4 = pnand %p195_p3, %p189_p0 }
   0xf   :  { %76 = vperm.xlu0 %185, %v73_v7  }
  0x7d   :  { %v50_v14 = vpop.permute.xlu1 %49 }
  0x7e   :  { %v34_v15 = vpop.permute.xlu0 %33 }
  0x7f   :  { %v41_v16 = vmul.f32 %v39_v12, %v34_v15 }
  0x81   :  { %v53_v20 = vadd.f32 %v50_v14, %v41_v16 }
  0x82   :  { %v29_v18 = vpop.permute.xlu0 %28  ;;  %v60_v19 = vpop.permute.xlu1 %59 }
  0x83   :  { %v67_v21 = vmul.f32 %v65_v17, %v60_v19  ;;  %v40_v22 = vmul.f32 %v39_v12, %v29_v18 }
  0x85   :  { %v69_v24 = vadd.f32 %v67_v21, %v53_v20 }
  0x86   :  { %v45_v23 = vpop.permute.xlu0 %44  ;;  %v56_v26 = vpop.permute.xlu1 %55 }
  0x87   :  { %v52_v25 = vadd.f32 %v45_v23, %v40_v22  ;;  %v66_v27 = vmul.f32 %v65_v17, %v56_v26  ;;  %v71_v28 = vmax.f32 %v69_v24, 0.0 }
  0x89   :  { %v68_v29 = vadd.f32 %v66_v27, %v52_v25  ;;  %174 = vmatpush3.msra.mxu0 %v71_v28 }
  0x8a   :  { %175 = vmatprep.subr.mxu0 %v212_v6  ;;  %v77_v32 = vpop.permute.xlu0 %76 }
  0x8b   :  { %v70_v30 = vmax.f32 %v68_v29, 0.0 }
  0x8d   :  { %176 = vmatpush3.msra.mxu0 %v70_v30 }
  0x8e   :  { %178 = vmatmul.mubr.msk.f32.vlgmr.msra.gmra.mxu0 %vm79_vm1, %v72_v31 }
 0x14e   :  { %v149_v33 = vpop.f32.mrf.mxu0 }
 0x14f   :  { %v150_v34 = vadd.f32 %v149_v33, %v77_v32 }
 0x150   :  { %v179_v35 = vpop.f32.mrf.mxu0 }
 0x151   :  { %154 = vst.msk [vmem:[#allocation2] sm:$0x3] %vm153_vm2, %v150_v34 }
 0x152   :  { %199 = shalt.err (!%p196_p4)
}
 0x153   :  { %164 = dma.vmem_to_hbm [thread:$0]  %s162_s29, 32, %s274_s5, [#allocation3]  }
 0x154   :  { %208 = dma.done.wait [#allocation3], 32  }
 0x155   :  { %209 = vsyncadd [#allocation3], 4294967264 }
 0x156   :  { %168 = vsyncpa [#allocation3], 1 }

</bundles_post_ra>
